<compile_context>
chip_gen: v6e
topology: v6e:2x2x1
jax: 0.10.0
libtpu: 0.0.40
codegen_flags: <defaults>
</compile_context>

<pallas_src>
import functools
import math

import jax
import jax.numpy as jnp
import numpy as np
from jax.experimental import pallas as pl
from jax.experimental.pallas import tpu as pltpu


# ------------------------------ small helpers -------------------------------

_VMEM_LIMIT = 64 * 1024 * 1024  # fits v7x's 64 MiB physical VMEM, > scoped defaults


def _cparams(dims):
    return pltpu.CompilerParams(dimension_semantics=dims, vmem_limit_bytes=_VMEM_LIMIT)


def _pick_tile(n, cap=512):
    """Largest power-of-two tile <= cap that divides n (falls back to n itself)."""
    if n % 8 != 0:
        return n
    t = 8
    while t * 2 <= cap and n % (t * 2) == 0:
        t *= 2
    return t


def _rotate_half(x):
    """Partner lanes for rotate-half RoPE on the per-head half-split channel layout."""
    h = x.shape[-1] // 2
    if x.shape[-1] % 128 == 0:
        return pltpu.roll(x, h, x.ndim - 1)   # lane-aligned halves -> XLU rotate (free slot)
    # sub-lane toy head dims: plain slice+concat (tiny)
    return jnp.concatenate([x[..., h:], x[..., :h]], axis=-1)


# ----------------------------- Pallas kernels ------------------------------

def qkv_kernel(x_ref, nw_ref, w_ref, q_ref, k_ref, v_ref, *,
               eps, n_heads, n_kv_heads, head_dim):
    """Fused RMSNorm + one concatenated QKV matmul; outputs written head-major."""
    x = x_ref[...].astype(jnp.float32)
    ms = jnp.mean(x * x, axis=-1, keepdims=True)
    xn = (x * jax.lax.rsqrt(ms + eps)).astype(x_ref.dtype) * nw_ref[...]
    qkv = jnp.dot(xn, w_ref[...], preferred_element_type=jnp.float32).astype(q_ref.dtype)
    nq = n_heads * head_dim
    nkv = n_kv_heads * head_dim
    for h in range(n_heads):
        q_ref[h, :, :] = qkv[:, h * head_dim:(h + 1) * head_dim]
    for h in range(n_kv_heads):
        k_ref[h, :, :] = qkv[:, nq + h * head_dim:nq + (h + 1) * head_dim]
        v_ref[h, :, :] = qkv[:, nq + nkv + h * head_dim:nq + nkv + (h + 1) * head_dim]


def rope_cache_kernel(cos_ref, sin_ref, k_ref, v_ref, ck_in, cv_in, ck_ref, cv_ref):
    """Rotate K once (per kv head / position) and write K,V into the aliased cache."""
    del ck_in, cv_in  # aliased HBM refs; untouched cache regions keep their old contents
    k = k_ref[...].astype(jnp.float32)
    k_rot = k * cos_ref[...] + _rotate_half(k) * sin_ref[...]
    ck_ref[...] = k_rot.astype(ck_ref.dtype)
    cv_ref[...] = v_ref[...]


def flash_attn_kernel(q_ref, k_ref, v_ref, cos_ref, sin_ref, o_ref,
                      q_scr, m_scr, l_scr, acc_scr,
                      *, scale, start_pos, q_tile, kv_tile):
    """Online-softmax attention. Q RoPE + scale applied once per q tile; K is pre-rotated."""
    qi = pl.program_id(2)
    t = pl.program_id(3)

    @pl.when(t == 0)
    def _init():
        q = q_ref[...].astype(jnp.float32)
        q_rot = q * cos_ref[...] + _rotate_half(q) * sin_ref[...]
        q_scr[...] = q_rot * scale
        m_scr[...] = jnp.full(m_scr.shape, -jnp.inf, jnp.float32)
        l_scr[...] = jnp.zeros(l_scr.shape, jnp.float32)
        acc_scr[...] = jnp.zeros(acc_scr.shape, jnp.float32)

    q_lo = start_pos + qi * q_tile   # absolute position of first query row in this tile
    kv_lo = t * kv_tile              # absolute position of first key column in this tile

    # Tile-level causal skip: only touch kv tiles with at least one unmasked key.
    @pl.when(kv_lo < q_lo + q_tile)
    def _compute():
        k = k_ref[...].astype(jnp.float32)
        s = jax.lax.dot_general(q_scr[...], k, (((1,), (1,)), ((), ())),
                                preferred_element_type=jnp.float32)     # (q_tile, kv_tile)
        row = jax.lax.broadcasted_iota(jnp.int32, s.shape, 0) + q_lo
        col = jax.lax.broadcasted_iota(jnp.int32, s.shape, 1) + kv_lo
        s = jnp.where(col <= row, s, -1e30)
        m_prev = m_scr[...]
        m_new = jnp.maximum(m_prev, jnp.max(s, axis=-1, keepdims=True))
        alpha = jnp.exp(m_prev - m_new)
        p = jnp.exp(s - m_new)
        l_scr[...] = alpha * l_scr[...] + jnp.sum(p, axis=-1, keepdims=True)
        acc_scr[...] = alpha * acc_scr[...] + jnp.dot(
            p.astype(v_ref.dtype), v_ref[...], preferred_element_type=jnp.float32)
        m_scr[...] = m_new

    @pl.when(t == pl.num_programs(3) - 1)
    def _finalize():
        # TODO(synk): flip to pl.reciprocal(..., approx=True) (EUP vrcp) once the 2e-4
        # tolerance budget is relaxed; kept exact here to keep the correctness check tight.
        o_ref[...] = (acc_scr[...] * pl.reciprocal(l_scr[...])).astype(o_ref.dtype)


def out_proj_kernel(a_ref, wo_ref, res_ref, o_ref):
    """wo projection (head-major input) with the residual add fused in."""
    acc = res_ref[...].astype(jnp.float32)
    for h in range(a_ref.shape[0]):
        acc = acc + jnp.dot(a_ref[h], wo_ref[h], preferred_element_type=jnp.float32)
    o_ref[...] = acc.astype(o_ref.dtype)


def ffn_kernel(h_ref, nw_ref, w1_ref, w3_ref, w2_ref, o_ref, hn_scr, acc_scr,
               *, eps, activation):
    """Fused RMSNorm + SwiGLU FFN + residual, streamed over hidden-dim tiles."""
    j = pl.program_id(1)

    @pl.when(j == 0)
    def _init():
        h = h_ref[...].astype(jnp.float32)
        ms = jnp.mean(h * h, axis=-1, keepdims=True)
        hn_scr[...] = (h * jax.lax.rsqrt(ms + eps)).astype(h_ref.dtype) * nw_ref[...]
        acc_scr[...] = h                         # residual folded into the accumulator

    hn = hn_scr[...].astype(w1_ref.dtype)
    a1 = jnp.dot(hn, w1_ref[...], preferred_element_type=jnp.float32)
    a3 = jnp.dot(hn, w3_ref[...], preferred_element_type=jnp.float32)
    if activation == "silu":
        act = a1 * jax.nn.sigmoid(a1)
    elif activation == "tanh":
        act = jnp.tanh(a1)
    else:
        raise ValueError("incorrect activation selection")
    g = (act * a3).astype(w2_ref.dtype)
    acc_scr[...] += jnp.dot(g, w2_ref[...], preferred_element_type=jnp.float32)

    @pl.when(j == pl.num_programs(1) - 1)
    def _finalize():
        o_ref[...] = acc_scr[...].astype(o_ref.dtype)


# ----------------------------- kernel wrappers ------------------------------

def fused_qkv(x2d, nw, wqkv_t, *, n_heads, n_kv_heads, head_dim, eps):
    M, D = x2d.shape
    Ntot = wqkv_t.shape[1]
    tm = _pick_tile(M, 512)
    flops = 2 * M * D * Ntot
    bytes_acc = 4 * (M * D + D * Ntot + M * Ntot)
    return pl.pallas_call(
        functools.partial(qkv_kernel, eps=eps, n_heads=n_heads,
                          n_kv_heads=n_kv_heads, head_dim=head_dim),
        out_shape=(jax.ShapeDtypeStruct((n_heads, M, head_dim), x2d.dtype),
                   jax.ShapeDtypeStruct((n_kv_heads, M, head_dim), x2d.dtype),
                   jax.ShapeDtypeStruct((n_kv_heads, M, head_dim), x2d.dtype)),
        grid=(M // tm,),
        in_specs=[pl.BlockSpec((tm, D), lambda i: (i, 0)),
                  pl.BlockSpec((1, D), lambda i: (0, 0)),
                  pl.BlockSpec((D, Ntot), lambda i: (0, 0))],
        out_specs=(pl.BlockSpec((n_heads, tm, head_dim), lambda i: (0, i, 0)),
                   pl.BlockSpec((n_kv_heads, tm, head_dim), lambda i: (0, i, 0)),
                   pl.BlockSpec((n_kv_heads, tm, head_dim), lambda i: (0, i, 0))),
        compiler_params=_cparams(("parallel",)),
        cost_estimate=pl.CostEstimate(flops=flops, transcendentals=0,
                                      bytes_accessed=bytes_acc),
    )(x2d, nw, wqkv_t)


def rope_and_cache_update(k_hmd, v_hmd, rope_cos, rope_sin, cache_k, cache_v, *,
                          batch, seqlen, start_pos):
    KVH, M, HD = k_hmd.shape
    ts = _pick_tile(seqlen, 256)
    assert start_pos % ts == 0  # TODO(synk): decode-time start_pos would use pl.Element offsets
    SP = seqlen // ts
    s0 = start_pos // ts
    return pl.pallas_call(
        rope_cache_kernel,
        out_shape=(jax.ShapeDtypeStruct(cache_k.shape, cache_k.dtype),
                   jax.ShapeDtypeStruct(cache_v.shape, cache_v.dtype)),
        grid=(batch, KVH, SP),
        in_specs=[pl.BlockSpec((ts, HD), lambda b, h, s: (s, 0)),
                  pl.BlockSpec((ts, HD), lambda b, h, s: (s, 0)),
                  pl.BlockSpec((None, ts, HD), lambda b, h, s: (h, b * SP + s, 0)),
                  pl.BlockSpec((None, ts, HD), lambda b, h, s: (h, b * SP + s, 0)),
                  pl.BlockSpec(memory_space=pl.ANY),
                  pl.BlockSpec(memory_space=pl.ANY)],
        out_specs=(pl.BlockSpec((None, None, ts, HD), lambda b, h, s: (b, h, s0 + s, 0)),
                   pl.BlockSpec((None, None, ts, HD), lambda b, h, s: (b, h, s0 + s, 0))),
        input_output_aliases={4: 0, 5: 1},
        compiler_params=_cparams(("parallel", "parallel", "parallel")),
    )(rope_cos, rope_sin, k_hmd, v_hmd, cache_k, cache_v)


def flash_attention(q_hmd, cache_k, cache_v, rope_cos, rope_sin, *,
                    batch, seqlen, kv_len, n_rep, scale, start_pos):
    H, M, HD = q_hmd.shape
    KVH = cache_k.shape[1]
    q_tile = _pick_tile(seqlen, 256)
    kv_tile = _pick_tile(kv_len, 256)
    SQ = seqlen // q_tile
    flops = 2 * batch * H * seqlen * kv_len * HD          # ~causal-halved MXU work
    bytes_acc = 4 * (2 * H * M * HD + 2 * batch * KVH * kv_len * HD)
    return pl.pallas_call(
        functools.partial(flash_attn_kernel, scale=scale, start_pos=start_pos,
                          q_tile=q_tile, kv_tile=kv_tile),
        out_shape=jax.ShapeDtypeStruct((H, M, HD), q_hmd.dtype),
        grid=(batch, H, SQ, kv_len // kv_tile),
        in_specs=[
            pl.BlockSpec((None, q_tile, HD), lambda b, h, qi, t: (h, b * SQ + qi, 0)),
            pl.BlockSpec((None, None, kv_tile, HD), lambda b, h, qi, t: (b, h // n_rep, t, 0)),
            pl.BlockSpec((None, None, kv_tile, HD), lambda b, h, qi, t: (b, h // n_rep, t, 0)),
            pl.BlockSpec((q_tile, HD), lambda b, h, qi, t: (qi, 0)),
            pl.BlockSpec((q_tile, HD), lambda b, h, qi, t: (qi, 0)),
        ],
        out_specs=pl.BlockSpec((None, q_tile, HD), lambda b, h, qi, t: (h, b * SQ + qi, 0)),
        scratch_shapes=[pltpu.VMEM((q_tile, HD), jnp.float32),   # rotated+scaled q
                        pltpu.VMEM((q_tile, 1), jnp.float32),    # running max
                        pltpu.VMEM((q_tile, 1), jnp.float32),    # running sum
                        pltpu.VMEM((q_tile, HD), jnp.float32)],  # output accumulator
        compiler_params=_cparams(("parallel", "parallel", "parallel", "arbitrary")),
        cost_estimate=pl.CostEstimate(flops=flops,
                                      transcendentals=batch * H * seqlen * kv_len,
                                      bytes_accessed=bytes_acc),
    )(q_hmd, cache_k, cache_v, rope_cos, rope_sin)


def out_proj_residual(attn_hmd, wo_r, res2d):
    H, M, HD = attn_hmd.shape
    D = wo_r.shape[-1]
    tm = _pick_tile(M, 512)
    flops = 2 * M * H * HD * D
    bytes_acc = 4 * (M * H * HD + H * HD * D + 2 * M * D)
    return pl.pallas_call(
        out_proj_kernel,
        out_shape=jax.ShapeDtypeStruct((M, D), res2d.dtype),
        grid=(M // tm,),
        in_specs=[pl.BlockSpec((H, tm, HD), lambda i: (0, i, 0)),
                  pl.BlockSpec((H, HD, D), lambda i: (0, 0, 0)),
                  pl.BlockSpec((tm, D), lambda i: (i, 0))],
        out_specs=pl.BlockSpec((tm, D), lambda i: (i, 0)),
        compiler_params=_cparams(("parallel",)),
        cost_estimate=pl.CostEstimate(flops=flops, transcendentals=0,
                                      bytes_accessed=bytes_acc),
    )(attn_hmd, wo_r, res2d)


def ffn_residual(h2d, nw, w1_t, w3_t, w2_t, *, eps, activation):
    M, D = h2d.shape
    Hid = w1_t.shape[1]
    tm = _pick_tile(M, 512)
    th = Hid
    for cand in (512, 256, 128):        # hidden-dim tile: lane-dense multiple of 128
        if Hid % cand == 0:
            th = cand
            break
    flops = 3 * 2 * M * D * Hid
    bytes_acc = 4 * (2 * M * D + 3 * D * Hid)
    return pl.pallas_call(
        functools.partial(ffn_kernel, eps=eps, activation=activation),
        out_shape=jax.ShapeDtypeStruct((M, D), h2d.dtype),
        grid=(M // tm, Hid // th),
        in_specs=[pl.BlockSpec((tm, D), lambda i, j: (i, 0)),
                  pl.BlockSpec((1, D), lambda i, j: (0, 0)),
                  pl.BlockSpec((D, th), lambda i, j: (0, j)),
                  pl.BlockSpec((D, th), lambda i, j: (0, j)),
                  pl.BlockSpec((th, D), lambda i, j: (j, 0))],
        out_specs=pl.BlockSpec((tm, D), lambda i, j: (i, 0)),
        scratch_shapes=[pltpu.VMEM((tm, D), jnp.float32),    # normed activations
                        pltpu.VMEM((tm, D), jnp.float32)],   # f32 accumulator (incl. residual)
        compiler_params=_cparams(("parallel", "arbitrary")),
        cost_estimate=pl.CostEstimate(flops=flops, transcendentals=M * Hid,
                                      bytes_accessed=bytes_acc),
    )(h2d, nw, w1_t, w3_t, w2_t)


# ----------------------- one-time parameter preparation -----------------------

def _permute_rope_rows(w, n_heads, head_dim):
    """Reorder each head's output channels to half-split ([evens, odds]) layout and
    transpose, so in-kernel RoPE is a lane-dense rotate-half. q.k is invariant under the
    shared permutation; V / wo stay in the original layout."""
    w_np = np.asarray(w)
    perm = np.concatenate([np.arange(0, head_dim, 2), np.arange(1, head_dim, 2)])
    idx = (np.arange(n_heads)[:, None] * head_dim + perm[None, :]).reshape(-1)
    return jnp.asarray(np.ascontiguousarray(w_np[idx].T))        # (D_in, n_heads*head_dim)


def prepare_block_params(raw, cfg, max_batch_size, max_seq_len):
    """Pre-transpose / RoPE-permute / concatenate weights ONCE; build the head-major cache."""
    H, KVH, HD = cfg["n_heads"], cfg["n_kv_heads"], cfg["head_dim"]
    D = raw["wq"].shape[1]
    wq_t = _permute_rope_rows(raw["wq"], H, HD)       # (D, H*HD)
    wk_t = _permute_rope_rows(raw["wk"], KVH, HD)     # (D, KVH*HD)
    wv_t = jnp.transpose(raw["wv"])                   # (D, KVH*HD)
    return {
        "wqkv_t": jnp.concatenate([wq_t, wk_t, wv_t], axis=1),
        "wo_r": jnp.transpose(raw["wo"]).reshape(H, HD, D),
        "w1_t": jnp.transpose(raw["w1"]),
        "w2_t": jnp.transpose(raw["w2"]),
        "w3_t": jnp.transpose(raw["w3"]),
        "attention_norm": raw["attention_norm"].reshape(1, -1),
        "ffn_norm": raw["ffn_norm"].reshape(1, -1),
        # KV cache kept head-major (B, KVH, T, HD) and holding *rotated* K, so attention
        # reads per-head tiles directly (no transposes, no per-tile K RoPE).
        "cache_k": jnp.zeros((max_batch_size, KVH, max_seq_len, HD), jnp.float32),
        "cache_v": jnp.zeros((max_batch_size, KVH, max_seq_len, HD), jnp.float32),
    }


# --------------------------- TransformerBlock fwd ---------------------------

def transformer_block_forward(x, kp, cfg, start_pos, cos, sin):
    # TODO(synk): decode (start_pos > 0) additionally needs rope tables covering the new
    # absolute-position window; the rotated head-major cache layout already supports it.
    B, S, D = x.shape
    H, KVH, HD = cfg["n_heads"], cfg["n_kv_heads"], cfg["head_dim"]
    n_rep = H // KVH
    eps = cfg["norm_eps"]
    M = B * S
    T = start_pos + S

    # rotate-half tables in half-split layout: cos duplicated, sin negated on the first half
    rope_cos = jnp.concatenate([cos, cos], axis=-1)        # (S, HD)
    rope_sin = jnp.concatenate([-sin, sin], axis=-1)       # (S, HD)

    x2d = x.reshape(M, D)

    # 1) fused RMSNorm + concatenated QKV projection (head-major outputs)
    q_hmd, k_hmd, v_hmd = fused_qkv(x2d, kp["attention_norm"], kp["wqkv_t"],
                                    n_heads=H, n_kv_heads=KVH, head_dim=HD, eps=eps)

    # 2) K RoPE (applied once) fused with the in-place KV-cache write (input_output_aliases)
    cache_k, cache_v = rope_and_cache_update(k_hmd, v_hmd, rope_cos, rope_sin,
                                             kp["cache_k"], kp["cache_v"],
                                             batch=B, seqlen=S, start_pos=start_pos)

    # 3) flash attention: q RoPE in-kernel, causal tile skipping, GQA via index_map
    attn_hmd = flash_attention(q_hmd, cache_k, cache_v, rope_cos, rope_sin,
                               batch=B, seqlen=S, kv_len=T, n_rep=n_rep,
                               scale=1.0 / math.sqrt(HD), start_pos=start_pos)

    # 4) wo projection + residual
    h2d = out_proj_residual(attn_hmd, kp["wo_r"], x2d)

    # 5) fused RMSNorm + SwiGLU FFN (hidden-dim streamed) + residual
    out2d = ffn_residual(h2d, kp["ffn_norm"], kp["w1_t"], kp["w3_t"], kp["w2_t"],
                         eps=eps, activation=cfg["activation"])
    return out2d.reshape(B, S, D), cache_k, cache_v


# ------------------------------ pure-JAX reference ------------------------------

def reference_forward(x, raw, cfg, start_pos, cos, sin):
    B, S, D = x.shape
    H, KVH, HD = cfg["n_heads"], cfg["n_kv_heads"], cfg["head_dim"]
    n_rep = H // KVH
    eps = cfg["norm_eps"]

    def rms(v, w):
        ms = jnp.mean(v.astype(jnp.float32) ** 2, axis=-1, keepdims=True)
        return (v * jax.lax.rsqrt(ms + eps)).astype(v.dtype) * w

    def rope(t):
        tr, ti = t[..., 0::2], t[..., 1::2]
        c = cos[None, :, None, :]
        s = sin[None, :, None, :]
        return jnp.stack([tr * c - ti * s, tr * s + ti * c], axis=-1).reshape(t.shape)

    xn = rms(x, raw["attention_norm"])
    xq = (xn @ raw["wq"].T).reshape(B, S, H, HD)
    xk = (xn @ raw["wk"].T).reshape(B, S, KVH, HD)
    xv = (xn @ raw["wv"].T).reshape(B, S, KVH, HD)
    xq, xk = rope(xq), rope(xk)
    keys = jnp.repeat(xk, n_rep, axis=2)
    values = jnp.repeat(xv, n_rep, axis=2)
    q = jnp.transpose(xq, (0, 2, 1, 3))
    k = jnp.transpose(keys, (0, 2, 1, 3))
    v = jnp.transpose(values, (0, 2, 1, 3))
    mask = jnp.triu(jnp.full((S, S), -1e30, dtype=jnp.float32), k=1)
    scores = jnp.einsum("bhsd,bhtd->bhst", q, k) / math.sqrt(HD) + mask
    p = jax.nn.softmax(scores.astype(jnp.float32), axis=-1)
    out = jnp.einsum("bhst,bhtd->bhsd", p, v)
    out = jnp.transpose(out, (0, 2, 1, 3)).reshape(B, S, H * HD)
    h = x + out @ raw["wo"].T
    hn = rms(h, raw["ffn_norm"])
    h1 = hn @ raw["w1"].T
    h3 = hn @ raw["w3"].T
    act = h1 * jax.nn.sigmoid(h1) if cfg["activation"] == "silu" else jnp.tanh(h1)
    return h + (act * h3) @ raw["w2"].T


# ----------------------------------- main -----------------------------------

if __name__ == "__main__":
    B, S = 2, 16
    dim, n_heads, n_kv_heads = 32, 4, 2
    head_dim = dim // n_heads
    multiple_of = 32
    norm_eps = 1e-5
    rope_theta = 500000.0
    max_batch_size, max_seq_len = 2, 16
    activation = "silu"
    start_pos = 0

    # FeedForward hidden dim, exactly as in the module
    hidden_dim = 4 * dim
    hidden_dim = int(2 * hidden_dim / 3)
    hidden_dim = multiple_of * ((hidden_dim + multiple_of - 1) // multiple_of)  # 96

    cfg = dict(n_heads=n_heads, n_kv_heads=n_kv_heads, head_dim=head_dim,
               norm_eps=norm_eps, activation=activation)

    key = jax.random.PRNGKey(0)
    ks = jax.random.split(key, 10)
    init = lambda k, shape: (0.05 * jax.random.normal(k, shape, dtype=jnp.float32))

    raw_params = {
        "wq": init(ks[0], (n_heads * head_dim, dim)),
        "wk": init(ks[1], (n_kv_heads * head_dim, dim)),
        "wv": init(ks[2], (n_kv_heads * head_dim, dim)),
        "wo": init(ks[3], (dim, n_heads * head_dim)),
        "w1": init(ks[4], (hidden_dim, dim)),
        "w2": init(ks[5], (dim, hidden_dim)),
        "w3": init(ks[6], (hidden_dim, dim)),
        "attention_norm": jnp.ones((dim,), jnp.float32),
        "ffn_norm": jnp.ones((dim,), jnp.float32),
    }
    kernel_params = prepare_block_params(raw_params, cfg, max_batch_size, max_seq_len)

    # rotary tables (freqs_cis equivalent as cos/sin), shape (S, head_dim // 2)
    freqs = 1.0 / (rope_theta ** (jnp.arange(0, head_dim, 2, dtype=jnp.float32) / head_dim))
    t = jnp.arange(start_pos, start_pos + S, dtype=jnp.float32)
    ang = jnp.outer(t, freqs)
    cos, sin = jnp.cos(ang), jnp.sin(ang)

    x = jax.random.normal(ks[7], (B, S, dim), dtype=jnp.float32)

    out, cache_k, cache_v = transformer_block_forward(x, kernel_params, cfg, start_pos, cos, sin)
    out = jax.block_until_ready(out)

    ref = jax.block_until_ready(reference_forward(x, raw_params, cfg, start_pos, cos, sin))
    np.testing.assert_allclose(np.asarray(out), np.asarray(ref), rtol=2e-4, atol=2e-4)

    print("KERNEL_OK")
</pallas_src>

<mosaic_0001>
module attributes {stable_mosaic.version = 11 : i64} {
  func.func @qkv_kernel(%arg0: i32, %arg1: memref<32x32xf32, #tpu.memory_space<vmem>>, %arg2: memref<1x32xf32, #tpu.memory_space<vmem>>, %arg3: memref<32x64xf32, #tpu.memory_space<vmem>>, %arg4: memref<4x32x8xf32, #tpu.memory_space<vmem>>, %arg5: memref<2x32x8xf32, #tpu.memory_space<vmem>>, %arg6: memref<2x32x8xf32, #tpu.memory_space<vmem>>) attributes {dimension_semantics = [#tpu.dimension_semantics<parallel>], iteration_bounds = array<i64: 1>, scalar_prefetch = 0 : i64, scratch_operands = 0 : i64, tpu.core_type = #tpu.core_type<tc>, window_params = [{transform_indices = @transform_0, window_bounds = array<i64: 32, 32>}, {pipeline_mode = #tpu.pipeline_mode<synchronous>, transform_indices = @transform_1, window_bounds = array<i64: 1, 32>}, {pipeline_mode = #tpu.pipeline_mode<synchronous>, transform_indices = @transform_2, window_bounds = array<i64: 32, 64>}, {transform_indices = @transform_3, window_bounds = array<i64: 4, 32, 8>}, {transform_indices = @transform_4, window_bounds = array<i64: 2, 32, 8>}, {transform_indices = @transform_5, window_bounds = array<i64: 2, 32, 8>}]} {
    %c0 = arith.constant 0 : index
    %c0_0 = arith.constant 0 : index
    %0 = vector.load %arg1[%c0, %c0_0] : memref<32x32xf32, #tpu.memory_space<vmem>>, vector<32x32xf32>
    %1 = arith.mulf %0, %0 : vector<32x32xf32>
    %cst = arith.constant dense<0.000000e+00> : vector<32xf32>
    %2 = vector.multi_reduction <add>, %1, %cst [1] : vector<32x32xf32> to vector<32xf32>
    %3 = vector.shape_cast %2 : vector<32xf32> to vector<32x1xf32>
    %cst_1 = arith.constant 3.200000e+01 : f32
    %4 = vector.broadcast %cst_1 : f32 to vector<32x1xf32>
    %5 = arith.divf %3, %4 : vector<32x1xf32>
    %cst_2 = arith.constant 9.99999974E-6 : f32
    %6 = vector.broadcast %cst_2 : f32 to vector<32x1xf32>
    %7 = arith.addf %5, %6 : vector<32x1xf32>
    %8 = math.rsqrt %7 : vector<32x1xf32>
    %9 = vector.broadcast %8 : vector<32x1xf32> to vector<32x32xf32>
    %10 = arith.mulf %0, %9 : vector<32x32xf32>
    %c0_3 = arith.constant 0 : index
    %c0_4 = arith.constant 0 : index
    %11 = vector.load %arg2[%c0_3, %c0_4] : memref<1x32xf32, #tpu.memory_space<vmem>>, vector<1x32xf32>
    %12 = vector.broadcast %11 : vector<1x32xf32> to vector<32x32xf32>
    %13 = arith.mulf %10, %12 : vector<32x32xf32>
    %c0_5 = arith.constant 0 : index
    %c0_6 = arith.constant 0 : index
    %14 = vector.load %arg3[%c0_5, %c0_6] : memref<32x64xf32, #tpu.memory_space<vmem>>, vector<32x64xf32>
    %cst_7 = arith.constant dense<0.000000e+00> : vector<32x64xf32>
    %15 = tpu.matmul %13, %14, %cst_7 {dimension_numbers = #tpu.dot_dimension_numbers<[1], [0], [0], [1], [0, 0, 1, 1], [], []>} : vector<32x32xf32>, vector<32x64xf32>, vector<32x64xf32> -> vector<32x64xf32>
    %16 = vector.extract_strided_slice %15 {offsets = [0, 0], sizes = [32, 8], strides = [1, 1]} : vector<32x64xf32> to vector<32x8xf32>
    %c0_8 = arith.constant 0 : index
    %c0_9 = arith.constant 0 : index
    %c0_10 = arith.constant 0 : index
    %17 = vector.load %arg4[%c0_8, %c0_9, %c0_10] : memref<4x32x8xf32, #tpu.memory_space<vmem>>, vector<1x32x8xf32>
    %18 = vector.shape_cast %17 : vector<1x32x8xf32> to vector<32x8xf32>
    %19 = vector.shape_cast %16 : vector<32x8xf32> to vector<1x32x8xf32>
    tpu.vector_store %arg4[%c0_8, %c0_9, %c0_10], %19 {strides = array<i32>} : memref<4x32x8xf32, #tpu.memory_space<vmem>>, vector<1x32x8xf32>,
    %20 = vector.extract_strided_slice %15 {offsets = [0, 8], sizes = [32, 8], strides = [1, 1]} : vector<32x64xf32> to vector<32x8xf32>
    %c1 = arith.constant 1 : index
    %c0_11 = arith.constant 0 : index
    %c0_12 = arith.constant 0 : index
    %21 = vector.load %arg4[%c1, %c0_11, %c0_12] : memref<4x32x8xf32, #tpu.memory_space<vmem>>, vector<1x32x8xf32>
    %22 = vector.shape_cast %21 : vector<1x32x8xf32> to vector<32x8xf32>
    %23 = vector.shape_cast %20 : vector<32x8xf32> to vector<1x32x8xf32>
    tpu.vector_store %arg4[%c1, %c0_11, %c0_12], %23 {strides = array<i32>} : memref<4x32x8xf32, #tpu.memory_space<vmem>>, vector<1x32x8xf32>,
    %24 = vector.extract_strided_slice %15 {offsets = [0, 16], sizes = [32, 8], strides = [1, 1]} : vector<32x64xf32> to vector<32x8xf32>
    %c2 = arith.constant 2 : index
    %c0_13 = arith.constant 0 : index
    %c0_14 = arith.constant 0 : index
    %25 = vector.load %arg4[%c2, %c0_13, %c0_14] : memref<4x32x8xf32, #tpu.memory_space<vmem>>, vector<1x32x8xf32>
    %26 = vector.shape_cast %25 : vector<1x32x8xf32> to vector<32x8xf32>
    %27 = vector.shape_cast %24 : vector<32x8xf32> to vector<1x32x8xf32>
    tpu.vector_store %arg4[%c2, %c0_13, %c0_14], %27 {strides = array<i32>} : memref<4x32x8xf32, #tpu.memory_space<vmem>>, vector<1x32x8xf32>,
    %28 = vector.extract_strided_slice %15 {offsets = [0, 24], sizes = [32, 8], strides = [1, 1]} : vector<32x64xf32> to vector<32x8xf32>
    %c3 = arith.constant 3 : index
    %c0_15 = arith.constant 0 : index
    %c0_16 = arith.constant 0 : index
    %29 = vector.load %arg4[%c3, %c0_15, %c0_16] : memref<4x32x8xf32, #tpu.memory_space<vmem>>, vector<1x32x8xf32>
    %30 = vector.shape_cast %29 : vector<1x32x8xf32> to vector<32x8xf32>
    %31 = vector.shape_cast %28 : vector<32x8xf32> to vector<1x32x8xf32>
    tpu.vector_store %arg4[%c3, %c0_15, %c0_16], %31 {strides = array<i32>} : memref<4x32x8xf32, #tpu.memory_space<vmem>>, vector<1x32x8xf32>,
    %32 = vector.extract_strided_slice %15 {offsets = [0, 32], sizes = [32, 8], strides = [1, 1]} : vector<32x64xf32> to vector<32x8xf32>
    %c0_17 = arith.constant 0 : index
    %c0_18 = arith.constant 0 : index
    %c0_19 = arith.constant 0 : index
    %33 = vector.load %arg5[%c0_17, %c0_18, %c0_19] : memref<2x32x8xf32, #tpu.memory_space<vmem>>, vector<1x32x8xf32>
    %34 = vector.shape_cast %33 : vector<1x32x8xf32> to vector<32x8xf32>
    %35 = vector.shape_cast %32 : vector<32x8xf32> to vector<1x32x8xf32>
    tpu.vector_store %arg5[%c0_17, %c0_18, %c0_19], %35 {strides = array<i32>} : memref<2x32x8xf32, #tpu.memory_space<vmem>>, vector<1x32x8xf32>,
    %36 = vector.extract_strided_slice %15 {offsets = [0, 48], sizes = [32, 8], strides = [1, 1]} : vector<32x64xf32> to vector<32x8xf32>
    %c0_20 = arith.constant 0 : index
    %c0_21 = arith.constant 0 : index
    %c0_22 = arith.constant 0 : index
    %37 = vector.load %arg6[%c0_20, %c0_21, %c0_22] : memref<2x32x8xf32, #tpu.memory_space<vmem>>, vector<1x32x8xf32>
    %38 = vector.shape_cast %37 : vector<1x32x8xf32> to vector<32x8xf32>
    %39 = vector.shape_cast %36 : vector<32x8xf32> to vector<1x32x8xf32>
    tpu.vector_store %arg6[%c0_20, %c0_21, %c0_22], %39 {strides = array<i32>} : memref<2x32x8xf32, #tpu.memory_space<vmem>>, vector<1x32x8xf32>,
    %40 = vector.extract_strided_slice %15 {offsets = [0, 40], sizes = [32, 8], strides = [1, 1]} : vector<32x64xf32> to vector<32x8xf32>
    %c1_23 = arith.constant 1 : index
    %c0_24 = arith.constant 0 : index
    %c0_25 = arith.constant 0 : index
    %41 = vector.load %arg5[%c1_23, %c0_24, %c0_25] : memref<2x32x8xf32, #tpu.memory_space<vmem>>, vector<1x32x8xf32>
    %42 = vector.shape_cast %41 : vector<1x32x8xf32> to vector<32x8xf32>
    %43 = vector.shape_cast %40 : vector<32x8xf32> to vector<1x32x8xf32>
    tpu.vector_store %arg5[%c1_23, %c0_24, %c0_25], %43 {strides = array<i32>} : memref<2x32x8xf32, #tpu.memory_space<vmem>>, vector<1x32x8xf32>,
    %44 = vector.extract_strided_slice %15 {offsets = [0, 56], sizes = [32, 8], strides = [1, 1]} : vector<32x64xf32> to vector<32x8xf32>
    %c1_26 = arith.constant 1 : index
    %c0_27 = arith.constant 0 : index
    %c0_28 = arith.constant 0 : index
    %45 = vector.load %arg6[%c1_26, %c0_27, %c0_28] : memref<2x32x8xf32, #tpu.memory_space<vmem>>, vector<1x32x8xf32>
    %46 = vector.shape_cast %45 : vector<1x32x8xf32> to vector<32x8xf32>
    %47 = vector.shape_cast %44 : vector<32x8xf32> to vector<1x32x8xf32>
    tpu.vector_store %arg6[%c1_26, %c0_27, %c0_28], %47 {strides = array<i32>} : memref<2x32x8xf32, #tpu.memory_space<vmem>>, vector<1x32x8xf32>,
    return
  }
  func.func @transform_0(%arg0: i32) -> (i32, i32) {
    %c0_i32 = arith.constant 0 : i32
    %c0_i32_0 = arith.constant 0 : i32
    return %arg0, %c0_i32 : i32, i32
  }
  func.func @transform_1(%arg0: i32) -> (i32, i32) {
    %c0_i32 = arith.constant 0 : i32
    %c0_i32_0 = arith.constant 0 : i32
    %c0_i32_1 = arith.constant 0 : i32
    return %c0_i32, %c0_i32_0 : i32, i32
  }
  func.func @transform_2(%arg0: i32) -> (i32, i32) {
    %c0_i32 = arith.constant 0 : i32
    %c0_i32_0 = arith.constant 0 : i32
    %c0_i32_1 = arith.constant 0 : i32
    return %c0_i32, %c0_i32_0 : i32, i32
  }
  func.func @transform_3(%arg0: i32) -> (i32, i32, i32) {
    %c0_i32 = arith.constant 0 : i32
    %c0_i32_0 = arith.constant 0 : i32
    %c0_i32_1 = arith.constant 0 : i32
    return %c0_i32, %arg0, %c0_i32_0 : i32, i32, i32
  }
  func.func @transform_4(%arg0: i32) -> (i32, i32, i32) {
    %c0_i32 = arith.constant 0 : i32
    %c0_i32_0 = arith.constant 0 : i32
    %c0_i32_1 = arith.constant 0 : i32
    return %c0_i32, %arg0, %c0_i32_0 : i32, i32, i32
  }
  func.func @transform_5(%arg0: i32) -> (i32, i32, i32) {
    %c0_i32 = arith.constant 0 : i32
    %c0_i32_0 = arith.constant 0 : i32
    %c0_i32_1 = arith.constant 0 : i32
    return %c0_i32, %arg0, %c0_i32_0 : i32, i32, i32
  }
}

</mosaic_0001>

<bundles_post_ra>
// kernel: tpu_custom_call.1
= control target key start
LH: loop header
LB: loop body
LE: loop exit
PB: predicated region body
PF: predicated region fallthrough
CT: control target
= control target key end

     0   :  { %11 = vsyncpa [#allocation3], 0  ;;  %s643_s0 = inlined_call_operand.hbm [shape: f32[32,32], index: 0, kind: input, shape index: {}]   ;;  %s644_s1 = inlined_call_operand.vmem [shape: f32[1,32], index: 1, kind: input, shape index: {}]   ;;  %s645_s2 = inlined_call_operand.hbm [shape: f32[32,64], index: 2, kind: input, shape index: {}]   ;;  %s646_s3 = inlined_call_operand.vmem [shape: f32[4,32,8], index: 3, kind: output, shape index: {0}]   ;;  %s647_s4 = inlined_call_operand.vmem [shape: f32[2,32,8], index: 4, kind: output, shape index: {1}]   ;;  %s648_s5 = inlined_call_operand.vmem [shape: f32[2,32,8], index: 5, kind: output, shape index: {2}]  }
   0x1   :  { %12 = vsyncpa [#allocation5], 0  ;;  %s453_s18 = smov [#allocation2]  }
   0x2   :  { %s18_s19 = sshll.u32 %s453_s18, 4  ;;  %s19_s19 = int_to_ptr.vmem [resolvable:$true] %s18_s19 }
   0x3   :  { %s417_s20 = scalar_lea.vmem %s19_s19, 512  ;;  %p422_p1 = scmp.lt.s32.totalorder %s19_s19, %s19_s19 }
   0x4   :  { %p418_p0 = scmp.ne.s32.totalorder %s19_s19, %s417_s20  ;;  %p423_p2 = scmp.lt.s32.totalorder %s417_s20, %s417_s20 }
   0x6   :  { %p424_p3 = por %p423_p2, %p422_p1 }
   0x8   :  { %p425_p4 = pnand %p424_p3, %p418_p0 }
   0xa   :  { %428 = shalt.err (!%p425_p4)
}
   0xb   :  { %s454_s21 = smov 128   ;;  %s455_s22 = smov 8  }
   0xc   :  { %24 = dma.hbm_to_vmem [thread:$0]  %s643_s0, 512, %s19_s19, [#allocation3], %s454_s21, %s454_s21, %s455_s22  }
   0xd   :  { %s456_s25 = smov [#allocation4]  }
   0xe   :  { %s32_s26 = sshll.u32 %s456_s25, 4  ;;  %s33_s26 = int_to_ptr.vmem [resolvable:$true] %s32_s26 }
   0xf   :  { %s437_s27 = scalar_lea.vmem %s33_s26, 512  ;;  %p442_p6 = scmp.lt.s32.totalorder %s33_s26, %s33_s26 }
  0x10   :  { %p438_p5 = scmp.ne.s32.totalorder %s33_s26, %s437_s27  ;;  %p443_p7 = scmp.lt.s32.totalorder %s437_s27, %s437_s27 }
  0x12   :  { %p444_p8 = por %p443_p7, %p442_p6 }
  0x14   :  { %p445_p9 = pnand %p444_p8, %p438_p5 }
  0x16   :  { %448 = shalt.err (!%p445_p9)
}
  0x17   :  { %38 = dma.hbm_to_vmem [thread:$0]  %s645_s2, 512, %s33_s26, [#allocation5], %s454_s21, %s454_s21, %s455_s22  }
  0x18   :  { %449 = dma.done.wait [#allocation3], 512  }
  0x19   :  { %450 = vsyncadd [#allocation3], 4294966784 }
  0x1a   :  { %451 = dma.done.wait [#allocation5], 512  }
  0x1b   :  { %452 = vsyncadd [#allocation5], 4294966784  ;;  %v45_v0 = vld [vmem:[#allocation2] sm:$0xff]  ;;  %vm53_vm0 = vcmask 261120   ;;  %v46_v1 = vld [vmem:[#allocation2 + $0x8] sm:$0xff]  ;;  %vm195_vm1 = vcmask 64512  }
  0x1c   :  { %v47_v2 = vld [vmem:[#allocation2 + $0x10] sm:$0xff]  ;;  %v49_v3 = vmul.f32 %v45_v0, %v45_v0  ;;  %v50_v4 = vmul.f32 %v46_v1, %v46_v1  ;;  %v48_v6 = vld [vmem:[#allocation2 + $0x18] sm:$0xff]  ;;  %v95_v14 = vld [vmem:[#allocation4 + $0x8] sm:$0xff]  ;;  %s457_s6 = smov 120   ;;  %s458_s13 = smov 112  }
  0x1d   :  { %v51_v5 = vmul.f32 %v47_v2, %v47_v2  ;;  %v52_v7 = vmul.f32 %v48_v6, %v48_v6  ;;  %v97_v12 = vld [vmem:[#allocation4 + $0x18] sm:$0xff]  ;;  %v96_v13 = vld [vmem:[#allocation4 + $0x10] sm:$0xff]  ;;  %v94_v15 = vld [vmem:[#allocation4] sm:$0xff]  ;;  %s459_s14 = smov 104   ;;  %s460_s15 = smov 96  }
  0x1e   :  { %v54_v8 = vsel %vm53_vm0, %v49_v3, 0.0  ;;  %v57_v9 = vsel %vm53_vm0, %v50_v4, 0.0  ;;  %368 = vmatprep.subr.mxu0 %v97_v12  ;;  %382 = vmatprep.subr.mxu1 %v97_v12  ;;  %v335_v29 = vld [vmem:[%s644_s1] ss:$0 sm:$0xff]  ;;  %s461_s16 = smov 80   ;;  %s462_s17 = smov 88  }
  0x1f   :  { %55 = vadd.xlane.f32.xlu0 %v54_v8  ;;  %58 = vadd.xlane.f32.xlu1 %v57_v9  ;;  %v60_v10 = vsel %vm53_vm0, %v51_v5, 0.0  ;;  %v63_v11 = vsel %vm53_vm0, %v52_v7, 0.0  ;;  %s463_s18 = smov 72  }
  0x20   :  { %369 = vmatpush3.msra.mxu0 %v97_v12  ;;  %386 = vmatpush3.msra.mxu1 %v97_v12 }
  0x21   :  { %370 = vmatprep.subr.mxu0 %v96_v13  ;;  %383 = vmatprep.subr.mxu1 %v96_v13 }
  0x22   :  { %371 = vmatpush3.msra.mxu0 %v96_v13  ;;  %387 = vmatpush3.msra.mxu1 %v96_v13 }
  0x23   :  { %61 = vadd.xlane.f32.xlu0 %v60_v10  ;;  %64 = vadd.xlane.f32.xlu1 %v63_v11 }
  0x24   :  { %372 = vmatprep.subr.mxu0 %v95_v14  ;;  %384 = vmatprep.subr.mxu1 %v95_v14 }
  0x25   :  { %373 = vmatpush3.msra.mxu0 %v95_v14  ;;  %388 = vmatpush3.msra.mxu1 %v95_v14 }
  0x26   :  { %374 = vmatprep.subr.mxu0 %v94_v15  ;;  %385 = vmatprep.subr.mxu1 %v94_v15 }
  0x27   :  { %375 = vmatpush3.msra.mxu0 %v94_v15  ;;  %389 = vmatpush3.msra.mxu1 %v94_v15 }
  0xa8   :  { %v56_v16 = vpop.xlane.xlu0 %55  ;;  %v59_v17 = vpop.xlane.xlu1 %58 }
  0xa9   :  { %v67_v18 = vmul.f32 0.03125, %v56_v16  ;;  %v68_v19 = vmul.f32 0.03125, %v59_v17 }
  0xab   :  { %v71_v20 = vadd.f32 1e-05, %v67_v18  ;;  %v72_v21 = vadd.f32 1e-05, %v68_v19 }
  0xac   :  { %v62_v22 = vpop.xlane.xlu0 %61  ;;  %v65_v23 = vpop.xlane.xlu1 %64 }
  0xad   :  { %401 = vrsqrt.f32 %v71_v20  ;;  %v69_v24 = vmul.f32 0.03125, %v62_v22  ;;  %v70_v25 = vmul.f32 0.03125, %v65_v23 }
  0xae   :  { %403 = vrsqrt.f32 %v72_v21 }
  0xaf   :  { %v73_v26 = vadd.f32 1e-05, %v69_v24  ;;  %v74_v27 = vadd.f32 1e-05, %v70_v25 }
  0xb1   :  { %405 = vrsqrt.f32 %v73_v26 }
  0xb2   :  { %407 = vrsqrt.f32 %v74_v27 }
  0xba   :  { %v402_v28 = vpop.eup %401 }
  0xbb   :  { %v404_v30 = vpop.eup %403  ;;  %v79_v31 = vmul.f32 %v402_v28, %v45_v0 }
  0xbc   :  { %v80_v32 = vmul.f32 %v404_v30, %v46_v1 }
  0xbd   :  { %v90_v33 = vmul.f32 %v335_v29, %v79_v31 }
  0xbe   :  { %v406_v34 = vpop.eup %405  ;;  %v91_v35 = vmul.f32 %v335_v29, %v80_v32 }
  0xbf   :  { %v408_v36 = vpop.eup %407  ;;  %376 = vmatprep.mubr.msk.f32.mxu0 %vm53_vm0, %v90_v33  ;;  %v81_v37 = vmul.f32 %v406_v34, %v47_v2 }
  0xc0   :  { %377 = vmatmul.mubr.msk.f32.vlgmr.msra.gmra.mxu0 %vm53_vm0, %v91_v35  ;;  %v82_v38 = vmul.f32 %v408_v36, %v48_v6 }
  0xc1   :  { %v92_v39 = vmul.f32 %v335_v29, %v81_v37 }
  0xc2   :  { %v93_v40 = vmul.f32 %v335_v29, %v82_v38 }
  0xc3   :  { %379 = vmatprep.mubr.msk.f32.mxu1 %vm53_vm0, %v92_v39 }
  0xc4   :  { %380 = vmatmul.mubr.msk.f32.vlgmr.msra.gmra.mxu1 %vm53_vm0, %v93_v40 }
 0x180   :  { %v378_v41 = vpop.f32.mrf.mxu0 }
 0x181   :  { %197 = vst.msk [vmem:[%s646_s3 + $0x8] sm:$0xff] %vm195_vm1, %v378_v41  ;;  %206 = vrot.lane.b32.xlu1 %v378_v41, %s457_s6 }
 0x182   :  { %v176_v42 = vpop.f32.mrf.mxu0 }
 0x183   :  { %196 = vst.msk [vmem:[%s646_s3] sm:$0xff] %vm195_vm1, %v176_v42  ;;  %204 = vrot.lane.b32.xlu0 %v176_v42, %s457_s6 }
 0x184   :  { %v381_v43 = vpop.f32.mrf.mxu1 }
 0x185   :  { %199 = vst.msk [vmem:[%s646_s3 + $0x18] sm:$0xff] %vm195_vm1, %v381_v43  ;;  %210 = vrot.lane.b32.xlu1 %v381_v43, %s457_s6 }
 0x186   :  { %v186_v44 = vpop.f32.mrf.mxu1 }
 0x187   :  { %198 = vst.msk [vmem:[%s646_s3 + $0x10] sm:$0xff] %vm195_vm1, %v186_v44  ;;  %221 = vrot.lane.b32.xlu0 %v176_v42, %s458_s13 }
 0x189   :  { %223 = vrot.lane.b32.xlu1 %v378_v41, %s458_s13 }
 0x18b   :  { %225 = vrot.lane.b32.xlu0 %v186_v44, %s458_s13 }
 0x18d   :  { %227 = vrot.lane.b32.xlu1 %v381_v43, %s458_s13 }
 0x18f   :  { %238 = vrot.lane.b32.xlu0 %v176_v42, %s459_s14 }
 0x191   :  { %240 = vrot.lane.b32.xlu1 %v378_v41, %s459_s14 }
 0x193   :  { %242 = vrot.lane.b32.xlu0 %v186_v44, %s459_s14 }
 0x195   :  { %244 = vrot.lane.b32.xlu1 %v381_v43, %s459_s14 }
 0x197   :  { %255 = vrot.lane.b32.xlu0 %v176_v42, %s460_s15 }
 0x199   :  { %257 = vrot.lane.b32.xlu1 %v378_v41, %s460_s15 }
 0x19b   :  { %259 = vrot.lane.b32.xlu0 %v186_v44, %s460_s15 }
 0x19d   :  { %261 = vrot.lane.b32.xlu1 %v381_v43, %s460_s15 }
 0x19f   :  { %271 = vrot.lane.b32.xlu0 %v176_v42, %s461_s16 }
 0x1a1   :  { %273 = vrot.lane.b32.xlu1 %v378_v41, %s461_s16 }
 0x1a3   :  { %275 = vrot.lane.b32.xlu0 %v186_v44, %s461_s16 }
 0x1a5   :  { %277 = vrot.lane.b32.xlu1 %v381_v43, %s461_s16 }
 0x1a7   :  { %287 = vrot.lane.b32.xlu0 %v176_v42, %s462_s17 }
 0x1a9   :  { %289 = vrot.lane.b32.xlu1 %v378_v41, %s462_s17 }
 0x1ab   :  { %291 = vrot.lane.b32.xlu0 %v186_v44, %s462_s17 }
 0x1ad   :  { %293 = vrot.lane.b32.xlu1 %v381_v43, %s462_s17 }
 0x1af   :  { %304 = vrot.lane.b32.xlu0 %v176_v42, %s463_s18 }
 0x1b1   :  { %306 = vrot.lane.b32.xlu1 %v378_v41, %s463_s18 }
 0x1b3   :  { %308 = vrot.lane.b32.xlu0 %v186_v44, %s463_s18 }
 0x1b5   :  { %208 = vrot.lane.b32.xlu1 %v186_v44, %s457_s6 }
 0x1b9   :  { %310 = vrot.lane.b32.xlu1 %v381_v43, %s463_s18 }
 0x1f3   :  { %v207_v45 = vpop.permute.xlu1 %206 }
 0x1f4   :  { %341 = vst.msk [vmem:[%s646_s3 + $0x28] sm:$0xff] %vm195_vm1, %v207_v45 }
 0x1f5   :  { %v205_v46 = vpop.permute.xlu0 %204 }
 0x1f6   :  { %340 = vst.msk [vmem:[%s646_s3 + $0x20] sm:$0xff] %vm195_vm1, %v205_v46 }
 0x1f7   :  { %v211_v47 = vpop.permute.xlu1 %210 }
 0x1f8   :  { %343 = vst.msk [vmem:[%s646_s3 + $0x38] sm:$0xff] %vm195_vm1, %v211_v47 }
 0x1f9   :  { %v222_v48 = vpop.permute.xlu0 %221 }
 0x1fa   :  { %344 = vst.msk [vmem:[%s646_s3 + $0x40] sm:$0xff] %vm195_vm1, %v222_v48 }
 0x1fb   :  { %v224_v49 = vpop.permute.xlu1 %223 }
 0x1fc   :  { %345 = vst.msk [vmem:[%s646_s3 + $0x48] sm:$0xff] %vm195_vm1, %v224_v49 }
 0x1fd   :  { %v226_v50 = vpop.permute.xlu0 %225 }
 0x1fe   :  { %346 = vst.msk [vmem:[%s646_s3 + $0x50] sm:$0xff] %vm195_vm1, %v226_v50 }
 0x1ff   :  { %v228_v51 = vpop.permute.xlu1 %227 }
 0x200   :  { %347 = vst.msk [vmem:[%s646_s3 + $0x58] sm:$0xff] %vm195_vm1, %v228_v51 }
 0x201   :  { %v239_v52 = vpop.permute.xlu0 %238 }
 0x202   :  { %348 = vst.msk [vmem:[%s646_s3 + $0x60] sm:$0xff] %vm195_vm1, %v239_v52 }
 0x203   :  { %v241_v53 = vpop.permute.xlu1 %240 }
 0x204   :  { %349 = vst.msk [vmem:[%s646_s3 + $0x68] sm:$0xff] %vm195_vm1, %v241_v53 }
 0x205   :  { %v243_v54 = vpop.permute.xlu0 %242 }
 0x206   :  { %350 = vst.msk [vmem:[%s646_s3 + $0x70] sm:$0xff] %vm195_vm1, %v243_v54 }
 0x207   :  { %v245_v55 = vpop.permute.xlu1 %244 }
 0x208   :  { %351 = vst.msk [vmem:[%s646_s3 + $0x78] sm:$0xff] %vm195_vm1, %v245_v55 }
 0x209   :  { %v256_v56 = vpop.permute.xlu0 %255 }
 0x20a   :  { %267 = vst.msk [vmem:[%s647_s4] sm:$0xff] %vm195_vm1, %v256_v56 }
 0x20b   :  { %v258_v57 = vpop.permute.xlu1 %257 }
 0x20c   :  { %268 = vst.msk [vmem:[%s647_s4 + $0x8] sm:$0xff] %vm195_vm1, %v258_v57 }
 0x20d   :  { %v260_v58 = vpop.permute.xlu0 %259 }
 0x20e   :  { %269 = vst.msk [vmem:[%s647_s4 + $0x10] sm:$0xff] %vm195_vm1, %v260_v58 }
 0x20f   :  { %v262_v59 = vpop.permute.xlu1 %261 }
 0x210   :  { %270 = vst.msk [vmem:[%s647_s4 + $0x18] sm:$0xff] %vm195_vm1, %v262_v59 }
 0x211   :  { %v272_v60 = vpop.permute.xlu0 %271 }
 0x212   :  { %283 = vst.msk [vmem:[%s648_s5] sm:$0xff] %vm195_vm1, %v272_v60 }
 0x213   :  { %v274_v61 = vpop.permute.xlu1 %273 }
 0x214   :  { %284 = vst.msk [vmem:[%s648_s5 + $0x8] sm:$0xff] %vm195_vm1, %v274_v61 }
 0x215   :  { %v276_v62 = vpop.permute.xlu0 %275 }
 0x216   :  { %285 = vst.msk [vmem:[%s648_s5 + $0x10] sm:$0xff] %vm195_vm1, %v276_v62 }
 0x217   :  { %v278_v63 = vpop.permute.xlu1 %277 }
 0x218   :  { %286 = vst.msk [vmem:[%s648_s5 + $0x18] sm:$0xff] %vm195_vm1, %v278_v63 }
 0x219   :  { %v288_v0 = vpop.permute.xlu0 %287 }
 0x21a   :  { %352 = vst.msk [vmem:[%s647_s4 + $0x20] sm:$0xff] %vm195_vm1, %v288_v0 }
 0x21b   :  { %v290_v1 = vpop.permute.xlu1 %289 }
 0x21c   :  { %353 = vst.msk [vmem:[%s647_s4 + $0x28] sm:$0xff] %vm195_vm1, %v290_v1 }
 0x21d   :  { %v292_v2 = vpop.permute.xlu0 %291 }
 0x21e   :  { %354 = vst.msk [vmem:[%s647_s4 + $0x30] sm:$0xff] %vm195_vm1, %v292_v2 }
 0x21f   :  { %v294_v3 = vpop.permute.xlu1 %293 }
 0x220   :  { %355 = vst.msk [vmem:[%s647_s4 + $0x38] sm:$0xff] %vm195_vm1, %v294_v3 }
 0x221   :  { %v305_v4 = vpop.permute.xlu0 %304 }
 0x222   :  { %356 = vst.msk [vmem:[%s648_s5 + $0x20] sm:$0xff] %vm195_vm1, %v305_v4 }
 0x223   :  { %v307_v5 = vpop.permute.xlu1 %306 }
 0x224   :  { %357 = vst.msk [vmem:[%s648_s5 + $0x28] sm:$0xff] %vm195_vm1, %v307_v5 }
 0x225   :  { %v309_v6 = vpop.permute.xlu0 %308 }
 0x226   :  { %358 = vst.msk [vmem:[%s648_s5 + $0x30] sm:$0xff] %vm195_vm1, %v309_v6 }
 0x227   :  { %v209_v7 = vpop.permute.xlu1 %208 }
 0x228   :  { %342 = vst.msk [vmem:[%s646_s3 + $0x30] sm:$0xff] %vm195_vm1, %v209_v7 }
 0x22b   :  { %v311_v8 = vpop.permute.xlu1 %310 }
 0x22c   :  { %359 = vst.msk [vmem:[%s648_s5 + $0x38] sm:$0xff] %vm195_vm1, %v311_v8 }
 0x22d   :  { %333 = vsyncpa [#allocation3], 1 }
 0x22e   :  { %334 = vsyncpa [#allocation5], 1 }

</bundles_post_ra>
